<compile_context>
chip_gen: v7x
topology: tpu7x:2x2x1
jax: 0.10.0
libtpu: 0.0.40
codegen_flags: <defaults>
</compile_context>

<pallas_src>
import functools

import numpy as np
import jax
import jax.numpy as jnp
from jax.experimental import pallas as pl
from jax.experimental.pallas import tpu as pltpu

LANE = 128


def _round_up(x, m):
    return (x + m - 1) // m * m


def _default_tanh_dtype():
    """bf16 EUP path on v6e/v7x; f32 elsewhere (v5e has no bf16 VPU/EUP)."""
    try:
        kind = jax.devices()[0].device_kind.lower()
    except Exception:
        return jnp.float32
    if "v6" in kind or "v7" in kind:
        return jnp.bfloat16
    return jnp.float32


def _value_kernel(x_ref,
                  w1_ref, b1_ref,
                  w2_ref, b2_ref,
                  w3_ref, b3_ref,
                  w4_ref, b4_ref,
                  o_ref, *, tanh_dtype):
    """One (TM, D) batch tile -> one (1, TM) lane-dense output row."""

    def layer(h, w_ref, b_ref):
        # MXU: bf16 operands, f32 accumulation.  tanh in f32 (v5e) or bf16
        # (v6e/v7x EUP path); result goes straight back to bf16 for the
        # next matmul.
        acc = jnp.dot(h, w_ref[...], preferred_element_type=jnp.float32)
        acc = acc + b_ref[...]
        return jnp.tanh(acc.astype(tanh_dtype)).astype(jnp.bfloat16)

    h = x_ref[...]                       # (TM, D) bf16
    h = layer(h, w1_ref, b1_ref)         # (TM, hs1p)
    h = layer(h, w2_ref, b2_ref)         # (TM, hs2p)
    h = layer(h, w3_ref, b3_ref)         # (TM, hs3p = 128)

    # Layer 4 (5 -> 1), lane-dense: (1, 128) x (TM, 128) contracting the
    # last dims -> (1, TM).  Padded lanes of w4 are zero, so they contribute
    # nothing.  No final activation (matches the PyTorch module).
    w4 = w4_ref[...].astype(h.dtype)     # (1, hs3p)
    row = jax.lax.dot_general(
        w4, h, (((1,), (1,)), ((), ())),
        preferred_element_type=jnp.float32)            # (1, TM)
    o_ref[...] = row + b4_ref[...]


def prepare_value_params(params):
    """Pad / bf16-cast the weights ONCE (hoisted out of the per-call path).

    params: [(W, b)] x 4, W stored as (fan_in, fan_out), b as (1, fan_out).
    """
    (w1, b1), (w2, b2), (w3, b3), (w4, b4) = params
    D, hs1 = w1.shape
    hs2 = w2.shape[1]
    hs3 = w3.shape[1]

    hs1p = _round_up(hs1, LANE)
    hs2p = _round_up(hs2, LANE)
    hs3p = _round_up(hs3, LANE)

    w1b = jnp.zeros((D, hs1p), jnp.bfloat16).at[:, :hs1].set(
        w1.astype(jnp.bfloat16))
    b1p = jnp.zeros((1, hs1p), jnp.float32).at[:, :hs1].set(b1)
    w2b = jnp.zeros((hs1p, hs2p), jnp.bfloat16).at[:hs1, :hs2].set(
        w2.astype(jnp.bfloat16))
    b2p = jnp.zeros((1, hs2p), jnp.float32).at[:, :hs2].set(b2)
    w3b = jnp.zeros((hs2p, hs3p), jnp.bfloat16).at[:hs2, :hs3].set(
        w3.astype(jnp.bfloat16))
    b3p = jnp.zeros((1, hs3p), jnp.float32).at[:, :hs3].set(b3)
    w4p = jnp.zeros((1, hs3p), jnp.float32).at[:, :hs3].set(w4.T)
    b4p = b4.reshape(1, 1).astype(jnp.float32)

    return dict(D=D, hs1p=hs1p, hs2p=hs2p, hs3p=hs3p,
                w1=w1b, b1=b1p, w2=w2b, b2=b2p,
                w3=w3b, b3=b3p, w4=w4p, b4=b4p)


def value_forward(x, prepared, *, tm=4096, tanh_dtype=None):
    """x: (B, D) float array.  prepared: output of prepare_value_params()."""
    if tanh_dtype is None:
        tanh_dtype = _default_tanh_dtype()

    B, D = x.shape
    assert D == prepared["D"]
    hs1p, hs2p, hs3p = prepared["hs1p"], prepared["hs2p"], prepared["hs3p"]

    # Batch tiling.  Small B: one full-extent tile.  Otherwise lane-aligned
    # tiles with >= 2 grid steps (so both v7x TensorCores get work), capped
    # at `tm` rows (4096-row bf16 x tile at D=32 is only 256 KiB of VMEM).
    if B <= 256:
        TM = _round_up(B, 16)
        Bp = TM
    else:
        half = -(-B // 2)
        TM = min(_round_up(tm, LANE), _round_up(half, LANE))
        Bp = _round_up(B, TM)
    grid = (Bp // TM,)

    xb = x.astype(jnp.bfloat16)
    if Bp != B:
        xb = jnp.pad(xb, ((0, Bp - B), (0, 0)))

    weights = (prepared["w1"], prepared["b1"], prepared["w2"], prepared["b2"],
               prepared["w3"], prepared["b3"], prepared["w4"], prepared["b4"])
    weight_bytes = int(sum(int(np.prod(w.shape)) * w.dtype.itemsize
                           for w in weights))

    # Single-buffer the resident weights only when they are big enough to
    # matter for the 64-MiB v7x VMEM (constant index_map => no perf cost).
    single_buffer = weight_bytes > (8 << 20)

    def w_spec(shape):
        idx = lambda i: (0,) * len(shape)
        if single_buffer:
            return pl.BlockSpec(shape, idx, pipeline_mode=pl.Buffered(1))
        return pl.BlockSpec(shape, idx)

    flops = 2 * Bp * (D * hs1p + hs1p * hs2p + hs2p * hs3p + hs3p)
    transcendentals = Bp * (hs1p + hs2p + hs3p)
    bytes_accessed = int(weight_bytes + xb.size * 2 + Bp * 4)

    # VMEM budget: resident weights (+dbl-buffer unless Buffered(1)) +
    # double-buffered x tile / output row + slack; capped at 48 MiB so v7x
    # (64 MiB physical) keeps headroom.
    wmul = 1 if single_buffer else 2
    io_vmem = 2 * (TM * D * 2 + TM * 4)
    vmem_limit = int(min(max(wmul * weight_bytes + io_vmem + (8 << 20),
                             16 << 20), 48 << 20))

    kernel = functools.partial(_value_kernel, tanh_dtype=tanh_dtype)

    out = pl.pallas_call(
        kernel,
        out_shape=jax.ShapeDtypeStruct((1, Bp), jnp.float32),
        grid=grid,
        in_specs=[
            pl.BlockSpec((TM, D), lambda i: (i, 0)),   # x tile (streams)
            w_spec((D, hs1p)),                         # W1 (VMEM-resident)
            w_spec((1, hs1p)),                         # b1
            w_spec((hs1p, hs2p)),                      # W2 (padded)
            w_spec((1, hs2p)),                         # b2
            w_spec((hs2p, hs3p)),                      # W3 (padded)
            w_spec((1, hs3p)),                         # b3
            w_spec((1, hs3p)),                         # W4 row (padded)
            w_spec((1, 1)),                            # b4
        ],
        out_specs=pl.BlockSpec((1, TM), lambda i: (0, i)),  # lane-dense row
        compiler_params=pltpu.CompilerParams(
            dimension_semantics=("parallel",),
            vmem_limit_bytes=vmem_limit),
        cost_estimate=pl.CostEstimate(
            flops=flops, transcendentals=transcendentals,
            bytes_accessed=bytes_accessed),
    )(xb, *weights)

    return out[0, :B].reshape(B, 1)


def init_params(key, input_size):
    """Init mirroring torch.nn.Linear default (uniform +-1/sqrt(fan_in))."""
    hs1 = input_size * 10
    hs3 = 5
    hs2 = int(np.round(np.sqrt(hs1 * hs3)))
    dims = [input_size, hs1, hs2, hs3, 1]

    params = []
    for i in range(len(dims) - 1):
        fan_in, fan_out = dims[i], dims[i + 1]
        key, kw, kb = jax.random.split(key, 3)
        bound = 1.0 / np.sqrt(fan_in)
        w = jax.random.uniform(kw, (fan_in, fan_out), jnp.float32, -bound, bound)
        b = jax.random.uniform(kb, (1, fan_out), jnp.float32, -bound, bound)
        params.append((w, b))
    return params


def value_reference(x, params, *, match_kernel=False, tanh_dtype=jnp.float32):
    """Pure-JAX reference.  match_kernel=True mimics the kernel precision
    (bf16 x/W operands, f32 accumulation, tanh at tanh_dtype)."""
    if not match_kernel:
        h = x
        for i, (w, b) in enumerate(params):
            h = h @ w + b
            if i != len(params) - 1:
                h = jnp.tanh(h)
        return h
    h = x.astype(jnp.bfloat16)
    for w, b in params[:-1]:
        acc = jnp.dot(h, w.astype(jnp.bfloat16),
                      preferred_element_type=jnp.float32) + b
        h = jnp.tanh(acc.astype(tanh_dtype)).astype(jnp.bfloat16)
    w4, b4 = params[-1]
    return jnp.dot(h, w4.astype(jnp.bfloat16),
                   preferred_element_type=jnp.float32) + b4


if __name__ == "__main__":
    key = jax.random.PRNGKey(0)
    B, D = 8, 32  # batch=8, input_size=32 -> hidden sizes [320, 40, 5], out 1

    key, kx = jax.random.split(key)
    x = jax.random.normal(kx, (B, D), jnp.float32)
    params = init_params(key, D)
    prepared = prepare_value_params(params)

    tanh_dtype = _default_tanh_dtype()
    out = jax.block_until_ready(value_forward(x, prepared,
                                              tanh_dtype=tanh_dtype))
    assert out.shape == (B, 1)

    # Primary check: precision-matched (bf16-operand) reference.
    ref_matched = value_reference(x, params, match_kernel=True,
                                  tanh_dtype=tanh_dtype)
    np.testing.assert_allclose(np.asarray(out), np.asarray(ref_matched),
                               rtol=2e-2, atol=2e-2)

    # Sanity check: pure-f32 reference (bf16-matmul tolerance).
    ref_f32 = value_reference(x, params)
    np.testing.assert_allclose(np.asarray(out), np.asarray(ref_f32),
                               rtol=5e-2, atol=5e-2)

    print("KERNEL_OK")
</pallas_src>

<mosaic_0001>
module attributes {stable_mosaic.version = 11 : i64} {
  func.func @_value_kernel(%arg0: i32, %arg1: memref<16x32xbf16, #tpu.memory_space<vmem>>, %arg2: memref<32x384xbf16, #tpu.memory_space<vmem>>, %arg3: memref<1x384xf32, #tpu.memory_space<vmem>>, %arg4: memref<384x128xbf16, #tpu.memory_space<vmem>>, %arg5: memref<1x128xf32, #tpu.memory_space<vmem>>, %arg6: memref<128x128xbf16, #tpu.memory_space<vmem>>, %arg7: memref<1x128xf32, #tpu.memory_space<vmem>>, %arg8: memref<1x128xf32, #tpu.memory_space<vmem>>, %arg9: memref<1x1xf32, #tpu.memory_space<vmem>>, %arg10: memref<1x16xf32, #tpu.memory_space<vmem>>) attributes {dimension_semantics = [#tpu.dimension_semantics<parallel>], iteration_bounds = array<i64: 1>, scalar_prefetch = 0 : i64, scratch_operands = 0 : i64, tpu.core_type = #tpu.core_type<tc>, window_params = [{transform_indices = @transform_0, window_bounds = array<i64: 16, 32>}, {pipeline_mode = #tpu.pipeline_mode<synchronous>, transform_indices = @transform_1, window_bounds = array<i64: 32, 384>}, {pipeline_mode = #tpu.pipeline_mode<synchronous>, transform_indices = @transform_2, window_bounds = array<i64: 1, 384>}, {pipeline_mode = #tpu.pipeline_mode<synchronous>, transform_indices = @transform_3, window_bounds = array<i64: 384, 128>}, {pipeline_mode = #tpu.pipeline_mode<synchronous>, transform_indices = @transform_4, window_bounds = array<i64: 1, 128>}, {pipeline_mode = #tpu.pipeline_mode<synchronous>, transform_indices = @transform_5, window_bounds = array<i64: 128, 128>}, {pipeline_mode = #tpu.pipeline_mode<synchronous>, transform_indices = @transform_6, window_bounds = array<i64: 1, 128>}, {pipeline_mode = #tpu.pipeline_mode<synchronous>, transform_indices = @transform_7, window_bounds = array<i64: 1, 128>}, {pipeline_mode = #tpu.pipeline_mode<synchronous>, transform_indices = @transform_8, window_bounds = array<i64: 1, 1>}, {transform_indices = @transform_9, window_bounds = array<i64: 1, 16>}]} {
    %c0 = arith.constant 0 : index
    %c0_0 = arith.constant 0 : index
    %0 = vector.load %arg1[%c0, %c0_0] : memref<16x32xbf16, #tpu.memory_space<vmem>>, vector<16x32xbf16>
    %c0_1 = arith.constant 0 : index
    %c0_2 = arith.constant 0 : index
    %1 = vector.load %arg2[%c0_1, %c0_2] : memref<32x384xbf16, #tpu.memory_space<vmem>>, vector<32x384xbf16>
    %cst = arith.constant dense<0.000000e+00> : vector<16x384xf32>
    %2 = tpu.matmul %0, %1, %cst {dimension_numbers = #tpu.dot_dimension_numbers<[1], [0], [0], [1], [0, 0, 1, 1], [], []>} : vector<16x32xbf16>, vector<32x384xbf16>, vector<16x384xf32> -> vector<16x384xf32>
    %c0_3 = arith.constant 0 : index
    %c0_4 = arith.constant 0 : index
    %3 = vector.load %arg3[%c0_3, %c0_4] : memref<1x384xf32, #tpu.memory_space<vmem>>, vector<1x384xf32>
    %4 = vector.broadcast %3 : vector<1x384xf32> to vector<16x384xf32>
    %5 = arith.addf %2, %4 : vector<16x384xf32>
    %6 = math.tanh %5 : vector<16x384xf32>
    %7 = arith.truncf %6 : vector<16x384xf32> to vector<16x384xbf16>
    %c0_5 = arith.constant 0 : index
    %c0_6 = arith.constant 0 : index
    %8 = vector.load %arg4[%c0_5, %c0_6] : memref<384x128xbf16, #tpu.memory_space<vmem>>, vector<384x128xbf16>
    %cst_7 = arith.constant dense<0.000000e+00> : vector<16x128xf32>
    %9 = tpu.matmul %7, %8, %cst_7 {dimension_numbers = #tpu.dot_dimension_numbers<[1], [0], [0], [1], [0, 0, 1, 1], [], []>} : vector<16x384xbf16>, vector<384x128xbf16>, vector<16x128xf32> -> vector<16x128xf32>
    %c0_8 = arith.constant 0 : index
    %c0_9 = arith.constant 0 : index
    %10 = vector.load %arg5[%c0_8, %c0_9] : memref<1x128xf32, #tpu.memory_space<vmem>>, vector<1x128xf32>
    %11 = vector.broadcast %10 : vector<1x128xf32> to vector<16x128xf32>
    %12 = arith.addf %9, %11 : vector<16x128xf32>
    %13 = math.tanh %12 : vector<16x128xf32>
    %14 = arith.truncf %13 : vector<16x128xf32> to vector<16x128xbf16>
    %c0_10 = arith.constant 0 : index
    %c0_11 = arith.constant 0 : index
    %15 = vector.load %arg6[%c0_10, %c0_11] : memref<128x128xbf16, #tpu.memory_space<vmem>>, vector<128x128xbf16>
    %cst_12 = arith.constant dense<0.000000e+00> : vector<16x128xf32>
    %16 = tpu.matmul %14, %15, %cst_12 {dimension_numbers = #tpu.dot_dimension_numbers<[1], [0], [0], [1], [0, 0, 1, 1], [], []>} : vector<16x128xbf16>, vector<128x128xbf16>, vector<16x128xf32> -> vector<16x128xf32>
    %c0_13 = arith.constant 0 : index
    %c0_14 = arith.constant 0 : index
    %17 = vector.load %arg7[%c0_13, %c0_14] : memref<1x128xf32, #tpu.memory_space<vmem>>, vector<1x128xf32>
    %18 = vector.broadcast %17 : vector<1x128xf32> to vector<16x128xf32>
    %19 = arith.addf %16, %18 : vector<16x128xf32>
    %20 = math.tanh %19 : vector<16x128xf32>
    %21 = arith.truncf %20 : vector<16x128xf32> to vector<16x128xbf16>
    %c0_15 = arith.constant 0 : index
    %c0_16 = arith.constant 0 : index
    %22 = vector.load %arg8[%c0_15, %c0_16] : memref<1x128xf32, #tpu.memory_space<vmem>>, vector<1x128xf32>
    %23 = arith.truncf %22 : vector<1x128xf32> to vector<1x128xbf16>
    %cst_17 = arith.constant dense<0.000000e+00> : vector<1x16xf32>
    %24 = tpu.matmul %23, %21, %cst_17 {dimension_numbers = #tpu.dot_dimension_numbers<[1], [1], [0], [0], [0, 0, 1, 0], [], []>} : vector<1x128xbf16>, vector<16x128xbf16>, vector<1x16xf32> -> vector<1x16xf32>
    %c0_18 = arith.constant 0 : index
    %c0_19 = arith.constant 0 : index
    %25 = vector.load %arg9[%c0_18, %c0_19] : memref<1x1xf32, #tpu.memory_space<vmem>>, vector<1x1xf32>
    %26 = vector.broadcast %25 : vector<1x1xf32> to vector<1x16xf32>
    %27 = arith.addf %24, %26 : vector<1x16xf32>
    %c0_20 = arith.constant 0 : index
    %c0_21 = arith.constant 0 : index
    %28 = vector.load %arg10[%c0_20, %c0_21] : memref<1x16xf32, #tpu.memory_space<vmem>>, vector<1x16xf32>
    tpu.vector_store %arg10[%c0_20, %c0_21], %27 {strides = array<i32>} : memref<1x16xf32, #tpu.memory_space<vmem>>, vector<1x16xf32>,
    return
  }
  func.func @transform_0(%arg0: i32) -> (i32, i32) {
    %c0_i32 = arith.constant 0 : i32
    %c0_i32_0 = arith.constant 0 : i32
    return %arg0, %c0_i32 : i32, i32
  }
  func.func @transform_1(%arg0: i32) -> (i32, i32) {
    %c0_i32 = arith.constant 0 : i32
    %c0_i32_0 = arith.constant 0 : i32
    %c0_i32_1 = arith.constant 0 : i32
    return %c0_i32, %c0_i32_0 : i32, i32
  }
  func.func @transform_2(%arg0: i32) -> (i32, i32) {
    %c0_i32 = arith.constant 0 : i32
    %c0_i32_0 = arith.constant 0 : i32
    %c0_i32_1 = arith.constant 0 : i32
    return %c0_i32, %c0_i32_0 : i32, i32
  }
  func.func @transform_3(%arg0: i32) -> (i32, i32) {
    %c0_i32 = arith.constant 0 : i32
    %c0_i32_0 = arith.constant 0 : i32
    %c0_i32_1 = arith.constant 0 : i32
    return %c0_i32, %c0_i32_0 : i32, i32
  }
  func.func @transform_4(%arg0: i32) -> (i32, i32) {
    %c0_i32 = arith.constant 0 : i32
    %c0_i32_0 = arith.constant 0 : i32
    %c0_i32_1 = arith.constant 0 : i32
    return %c0_i32, %c0_i32_0 : i32, i32
  }
  func.func @transform_5(%arg0: i32) -> (i32, i32) {
    %c0_i32 = arith.constant 0 : i32
    %c0_i32_0 = arith.constant 0 : i32
    %c0_i32_1 = arith.constant 0 : i32
    return %c0_i32, %c0_i32_0 : i32, i32
  }
  func.func @transform_6(%arg0: i32) -> (i32, i32) {
    %c0_i32 = arith.constant 0 : i32
    %c0_i32_0 = arith.constant 0 : i32
    %c0_i32_1 = arith.constant 0 : i32
    return %c0_i32, %c0_i32_0 : i32, i32
  }
  func.func @transform_7(%arg0: i32) -> (i32, i32) {
    %c0_i32 = arith.constant 0 : i32
    %c0_i32_0 = arith.constant 0 : i32
    %c0_i32_1 = arith.constant 0 : i32
    return %c0_i32, %c0_i32_0 : i32, i32
  }
  func.func @transform_8(%arg0: i32) -> (i32, i32) {
    %c0_i32 = arith.constant 0 : i32
    %c0_i32_0 = arith.constant 0 : i32
    %c0_i32_1 = arith.constant 0 : i32
    return %c0_i32, %c0_i32_0 : i32, i32
  }
  func.func @transform_9(%arg0: i32) -> (i32, i32) {
    %c0_i32 = arith.constant 0 : i32
    %c0_i32_0 = arith.constant 0 : i32
    return %c0_i32, %arg0 : i32, i32
  }
}

</mosaic_0001>

<bundles_post_ra>
// kernel: tpu_custom_call.1
= control target key start
LH: loop header
LB: loop body
LE: loop exit
PB: predicated region body
PF: predicated region fallthrough
CT: control target
= control target key end

     0   :  { %s1247_s0 = inlined_call_operand.hbm [shape: bf16[16,32], index: 0, kind: input, shape index: {}]   ;;  %s1248_s1 = inlined_call_operand.hbm [shape: bf16[32,384], index: 1, kind: input, shape index: {}]   ;;  %s1249_s2 = inlined_call_operand.vmem [shape: f32[1,384], index: 2, kind: input, shape index: {}]   ;;  %s1250_s3 = inlined_call_operand.hbm [shape: bf16[384,128], index: 3, kind: input, shape index: {}]   ;;  %s1251_s4 = inlined_call_operand.vmem [shape: f32[1,128], index: 4, kind: input, shape index: {}]   ;;  %s1252_s5 = inlined_call_operand.hbm [shape: bf16[128,128], index: 5, kind: input, shape index: {}]   ;;  %s1253_s6 = inlined_call_operand.vmem [shape: f32[1,128], index: 6, kind: input, shape index: {}]   ;;  %s1254_s7 = inlined_call_operand.vmem [shape: f32[1,128], index: 7, kind: input, shape index: {}]   ;;  %s1255_s8 = inlined_call_operand.<no memory space> [shape: f32[1,1], index: 8, kind: input, shape index: {}]   ;;  %s1256_s9 = inlined_call_operand.hbm [shape: f32[1,16], index: 9, kind: output, shape index: {}]  }
   0x1   :  { %v14_v0 = vstv %s1255_s8 }
   0x2   :  { %15 = vst [vmem:[#allocation2] sm:$0x1] %v14_v0 }
   0x3   :  { %16 = vsyncpa [#allocation4], 0 }
   0x4   :  { %17 = vsyncpa [#allocation7], 0 }
   0x5   :  { %18 = vsyncpa [#allocation10], 0 }
   0x6   :  { %19 = vsyncpa [#allocation5], 0  ;;  %s1056_s11 = smov [#allocation6]   ;;  %s938_s15 = scalar_lea.hbm %s1248_s1, 768 }
   0x7   :  { %s37_s12 = sshll.u32 %s1056_s11, 4  ;;  %p939_p0 = scmp.ne.s32.totalorder %s1248_s1, %s938_s15  ;;  %s38_s12 = int_to_ptr.vmem [resolvable:$true] %s37_s12 }
   0x8   :  { %p942_p1 = scmp.lt.u32.totalorder %s938_s15, %s1248_s1 }
   0xa   :  { %p944_p2 = pnand %p942_p1, %p939_p0 }
   0xc   :  { %947 = shalt.err (!%p944_p2)
}
   0xd   :  { %s948_s8 = scalar_lea.vmem %s38_s12, 768  ;;  %p953_p4 = scmp.lt.s32.totalorder %s38_s12, %s38_s12 }
   0xe   :  { %p949_p3 = scmp.ne.s32.totalorder %s38_s12, %s948_s8  ;;  %p954_p5 = scmp.lt.s32.totalorder %s948_s8, %s948_s8 }
  0x10   :  { %p955_p6 = por %p954_p5, %p953_p4 }
  0x12   :  { %p956_p7 = pnand %p955_p6, %p949_p3 }
  0x14   :  { %959 = shalt.err (!%p956_p7)
}
  0x15   :  { %s1057_s20 = smov 192   ;;  %s1058_s21 = smov 12  }
  0x16   :  { %43 = dma.hbm_to_vmem [thread:$0]  %s1248_s1, 768, %s38_s12, [#allocation7], %s1057_s20, %s1057_s20, %s1058_s21  }
  0x17   :  { %s1059_s24 = smov [#allocation3]   ;;  %s960_s28 = scalar_lea.hbm %s1247_s0, 128 }
  0x18   :  { %s25_s25 = sshll.u32 %s1059_s24, 4  ;;  %p961_p8 = scmp.ne.s32.totalorder %s1247_s0, %s960_s28  ;;  %s26_s25 = int_to_ptr.vmem [resolvable:$true] %s25_s25 }
  0x19   :  { %p964_p9 = scmp.lt.u32.totalorder %s960_s28, %s1247_s0 }
  0x1b   :  { %p966_p10 = pnand %p964_p9, %p961_p8 }
  0x1d   :  { %969 = shalt.err (!%p966_p10)
}
  0x1e   :  { %s970_s13 = scalar_lea.vmem %s26_s25, 128  ;;  %p975_p12 = scmp.lt.s32.totalorder %s26_s25, %s26_s25 }
  0x1f   :  { %p971_p11 = scmp.ne.s32.totalorder %s26_s25, %s970_s13  ;;  %p976_p13 = scmp.lt.s32.totalorder %s970_s13, %s970_s13 }
  0x21   :  { %p977_p0 = por %p976_p13, %p975_p12 }
  0x23   :  { %p978_p1 = pnand %p977_p0, %p971_p11 }
  0x25   :  { %981 = shalt.err (!%p978_p1)
}
  0x26   :  { %s1060_s1 = smov 64   ;;  %s1061_s12 = smov 4  }
  0x27   :  { %31 = dma.hbm_to_vmem [thread:$0]  %s1247_s0, 128, %s26_s25, [#allocation4], %s1060_s1, %s1060_s1, %s1061_s12  }
  0x28   :  { %s1062_s16 = smov [#allocation8]   ;;  %s1063_s18 = smov [#allocation9]  }
  0x29   :  { %s51_s17 = sshll.u32 %s1062_s16, 4  ;;  %s65_s19 = sshll.u32 %s1063_s18, 4  ;;  %s52_s17 = int_to_ptr.vmem [resolvable:$true] %s51_s17  ;;  %s1148_s19 = int_to_ptr.vmem [resolvable:$true] %s65_s19 }
  0x2a   :  { %s982_s21 = scalar_lea.hbm %s1250_s3, 3072 }
  0x2b   :  { %p983_p2 = scmp.ne.s32.totalorder %s1250_s3, %s982_s21  ;;  %p986_p3 = scmp.lt.u32.totalorder %s982_s21, %s1250_s3 }
  0x2d   :  { %p988_p4 = pnand %p986_p3, %p983_p2 }
  0x2f   :  { %991 = shalt.err (!%p988_p4)
}
  0x30   :  { %s992_s0 = scalar_lea.vmem %s52_s17, 3072  ;;  %p997_p6 = scmp.lt.s32.totalorder %s52_s17, %s52_s17 }
  0x31   :  { %p993_p5 = scmp.ne.s32.totalorder %s52_s17, %s992_s0  ;;  %p998_p7 = scmp.lt.s32.totalorder %s992_s0, %s992_s0 }
  0x33   :  { %p999_p8 = por %p998_p7, %p997_p6 }
  0x35   :  { %p1000_p9 = pnand %p999_p8, %p993_p5 }
  0x37   :  { %1003 = shalt.err (!%p1000_p9)
}
  0x38   :  { %57 = dma.hbm_to_vmem [thread:$0]  %s1250_s3, 3072, %s52_s17, [#allocation7], %s1060_s1, %s1060_s1, %s1061_s12  }
  0x39   :  { %s1004_s30 = scalar_lea.hbm %s1252_s5, 1024 }
  0x3a   :  { %p1005_p10 = scmp.ne.s32.totalorder %s1252_s5, %s1004_s30  ;;  %p1008_p11 = scmp.lt.u32.totalorder %s1004_s30, %s1252_s5 }
  0x3c   :  { %p1010_p12 = pnand %p1008_p11, %p1005_p10 }
  0x3e   :  { %1013 = shalt.err (!%p1010_p12)
}
  0x3f   :  { %s1014_s15 = scalar_lea.vmem %s1148_s19, 1024  ;;  %p1019_p0 = scmp.lt.s32.totalorder %s1148_s19, %s1148_s19 }
  0x40   :  { %p1015_p13 = scmp.ne.s32.totalorder %s1148_s19, %s1014_s15  ;;  %p1020_p1 = scmp.lt.s32.totalorder %s1014_s15, %s1014_s15 }
  0x42   :  { %p1021_p2 = por %p1020_p1, %p1019_p0 }
  0x44   :  { %p1022_p3 = pnand %p1021_p2, %p1015_p13 }
  0x46   :  { %1025 = shalt.err (!%p1022_p3)
}
  0x47   :  { %71 = dma.hbm_to_vmem [thread:$0]  %s1252_s5, 1024, %s1148_s19, [#allocation10], %s1060_s1, %s1060_s1, %s1061_s12  }
  0x48   :  { %1048 = dma.done.wait [#allocation4], 128  }
  0x49   :  { %1049 = vsyncadd [#allocation4], 4294967168 }
  0x4a   :  { %1050 = dma.done.wait [#allocation7], 3840  }
  0x4b   :  { %1051 = vsyncadd [#allocation7], 4294963456 }
  0x4c   :  { %1052 = dma.done.wait [#allocation10], 1024  }
  0x4d   :  { %1053 = vsyncadd [#allocation10], 4294966272  ;;  %v1064_v1 = vmov 0   ;;  %v877_v2 = vld [vmem:[#allocation6 + $0x4] ss:$12 sps:$4 sm:$0xff]   ;;  %v883_v6 = vld [vmem:[#allocation3] sm:$0xff]   ;;  %v103_v34 = vlaneseq }
  0x4e   :  { %191 = vmatprep.mubr.bf16.mxu1 %v1064_v1  ;;  %876 = vset.pattern.permute.xlu0 %v1064_v1  ;;  %v879_v3 = vld [vmem:[#allocation6] ss:$12 sps:$4 sm:$0xff]   ;;  %v880_v4 = vld [vmem:[#allocation6 + $0x1c] ss:$12 sps:$4 sm:$0xff]   ;;  %v882_v5 = vld [vmem:[#allocation6 + $0x18] ss:$12 sps:$4 sm:$0xff]  }
  0x4f   :  { %159 = vmatprep.subr.bf16.mxu1 %v877_v2  ;;  %v884_v7 = vld [vmem:[#allocation6 + $0x8] ss:$12 sps:$4 sm:$0xff]   ;;  %vm155_vm0 = vcmask 261120   ;;  %v1065_v10 = vmov 0.0   ;;  %v888_v11 = vld [vmem:[#allocation8 + $0x48] sm:$0xff]   ;;  %vm1066_vm1 = vmmov 0  }
  0x50   :  { %160 = vmatpush1.bf16.msra.mxu1 %v879_v3  ;;  %v886_v8 = vld [vmem:[#allocation8 + $0x40] sm:$0xff]   ;;  %v889_v12 = vld [vmem:[#allocation8 + $0x8] sm:$0xff]   ;;  %v885_v13 = vld [vmem:[#allocation6 + $0x20] ss:$12 sps:$4 sm:$0xff]   ;;  %v1203_v35 = vshrl.u32 %v103_v34, 7  ;;  %vm703_vm2 = vcmask 122880  }
  0x51   :  { %161 = vmatprep.subr.bf16.mxu1 %v880_v4  ;;  %v887_v9 = vld [vmem:[#allocation8] sm:$0xff]   ;;  %768 = vmatprep.subr.bf16.mxu0 %v886_v8  ;;  %v891_v14 = vld [vmem:[#allocation8 + $0x50] sm:$0xff]   ;;  %v893_v17 = vld [vmem:[#allocation8 + $0x88] sm:$0xff]  }
  0x52   :  { %769 = vmatpush3.bf16.msra.mxu0 %v887_v9  ;;  %v890_v15 = vld [vmem:[#allocation8 + $0x80] sm:$0xff]   ;;  %v892_v16 = vld [vmem:[#allocation8 + $0x10] sm:$0xff]   ;;  %v894_v18 = vld [vmem:[#allocation8 + $0x58] sm:$0xff]   ;;  %v105_v36 = vsub.s32 0, %v1203_v35  ;;  %v109_v38 = vsub.s32 1, %v1203_v35  ;;  %v113_v44 = vsub.s32 2, %v1203_v35 }
  0x53   :  { %770 = vmatprep.subr.bf16.mxu0 %v888_v11  ;;  %v895_v19 = vld [vmem:[#allocation8 + $0x18] sm:$0xff]   ;;  %v896_v20 = vld [vmem:[#allocation8 + $0x90] sm:$0xff]   ;;  %v897_v21 = vld [vmem:[#allocation8 + $0x60] sm:$0xff]  }
  0x54   :  { %162 = vmatpush1.bf16.msra.mxu1 %v882_v5  ;;  %v898_v22 = vld [vmem:[#allocation8 + $0x20] sm:$0xff]   ;;  %v899_v23 = vld [vmem:[#allocation8 + $0x98] sm:$0xff]   ;;  %v900_v24 = vld [vmem:[#allocation8 + $0x68] sm:$0xff]  }
  0x55   :  { %810 = vmatprep.subr.bf16.mxu1 %v1065_v10  ;;  %v901_v25 = vld [vmem:[#allocation8 + $0x28] sm:$0xff]   ;;  %v902_v26 = vld [vmem:[#allocation8 + $0xa0] sm:$0xff]   ;;  %v903_v27 = vld [vmem:[#allocation8 + $0x70] sm:$0xff]  }
  0x56   :  { %771 = vmatpush3.bf16.msra.mxu0 %v889_v12  ;;  %v904_v28 = vld [vmem:[#allocation8 + $0x30] sm:$0xff]   ;;  %v905_v29 = vld [vmem:[#allocation8 + $0xa8] sm:$0xff]   ;;  %v906_v30 = vld [vmem:[#allocation8 + $0x78] sm:$0xff]  }
  0x57   :  { %729 = vmatmul.mubr.msk.bf16.vlgmr.msra.gmra.mrb[0].mxu1 %vm155_vm0, %v883_v6  ;;  %772 = vmatprep.subr.bf16.mxu0 %v891_v14  ;;  %v907_v31 = vld [vmem:[#allocation8 + $0x38] sm:$0xff]   ;;  %v908_v32 = vld [vmem:[#allocation8 + $0xb0] sm:$0xff]   ;;  %v101_v37 = vld [vmem:[%s1249_s2] sm:$0x7] }
  0x58   :  { %811 = vmatpush3.bf16.msra.mxu1 %v884_v7  ;;  %814 = vmatprep.mubr.msk.bf16.mxu1 %vm1066_vm1, %v1065_v10  ;;  %v909_v33 = vld [vmem:[#allocation8 + $0xb8] sm:$0xff]   ;;  %v106_v39 = vrot.slane %v101_v37, %v105_v36  ;;  %v110_v40 = vrot.slane %v101_v37, %v109_v38  ;;  %v114_v50 = vrot.slane %v101_v37, %v113_v44  ;;  %v910_v63 = vld [vmem:[#allocation9] sm:$0xff]   ;;  %v911_v0 = vld [vmem:[#allocation9 + $0x8] sm:$0xff]  }
  0x59   :  { %812 = vmatprep.subr.bf16.mxu1 %v1065_v10  ;;  %v912_v4 = vld [vmem:[#allocation9 + $0x10] sm:$0xff]   ;;  %v913_v5 = vld [vmem:[#allocation9 + $0x18] sm:$0xff]   ;;  %v915_v7 = vld [vmem:[#allocation9 + $0x28] sm:$0xff]  }
  0x5a   :  { %773 = vmatpush3.bf16.msra.mxu0 %v892_v16  ;;  %v916_v8 = vld [vmem:[#allocation9 + $0x30] sm:$0xff]   ;;  %v917_v9 = vld [vmem:[#allocation9 + $0x38] sm:$0xff]  }
  0x5b   :  { %774 = vmatprep.subr.bf16.mxu0 %v894_v18 }
  0x5c   :  { %813 = vmatpush3.bf16.msra.mxu1 %v885_v13  ;;  %v731_v13 = vld [vmem:[%s1251_s4] ss:$0 sm:$0xff] }
  0x5d   :  { %818 = vmatprep.subr.bf16.mxu1 %v1065_v10 }
  0x5e   :  { %775 = vmatpush3.bf16.msra.mxu0 %v895_v19 }
  0x5f   :  { %815 = vmatmul.mubr.msk.bf16.vlgmr.msra.gmra.mrb[4].mxu1 %vm155_vm0, %v883_v6  ;;  %776 = vmatprep.subr.bf16.mxu0 %v897_v21  ;;  %v914_v6 = vld [vmem:[#allocation9 + $0x20] sm:$0xff]  }
  0x60   :  { %819 = vmatpush3.bf16.msra.mxu1 %v890_v15  ;;  %834 = vmatprep.mubr.msk.bf16.mxu1 %vm1066_vm1, %v1065_v10 }
  0x61   :  { %820 = vmatprep.subr.bf16.mxu1 %v1065_v10 }
  0x62   :  { %777 = vmatpush3.bf16.msra.mxu0 %v898_v22 }
  0x63   :  { %778 = vmatprep.subr.bf16.mxu0 %v900_v24 }
  0x64   :  { %821 = vmatpush3.bf16.msra.mxu1 %v893_v17 }
  0x65   :  { %822 = vmatprep.subr.bf16.mxu1 %v1065_v10 }
  0x66   :  { %779 = vmatpush3.bf16.msra.mxu0 %v901_v25 }
  0x67   :  { %780 = vmatprep.subr.bf16.mxu0 %v903_v27 }
  0x68   :  { %823 = vmatpush3.bf16.msra.mxu1 %v896_v20 }
  0x69   :  { %824 = vmatprep.subr.bf16.mxu1 %v1065_v10 }
  0x6a   :  { %781 = vmatpush3.bf16.msra.mxu0 %v904_v28  ;;  %v653_v28 = vld [vmem:[#allocation2] sm:$0x1] }
  0x6b   :  { %782 = vmatprep.subr.bf16.mxu0 %v906_v30  ;;  %656 = vperm.xlu0 %876, %v653_v28  }
  0x6c   :  { %825 = vmatpush3.bf16.msra.mxu1 %v899_v23 }
  0x6d   :  { %826 = vmatprep.subr.bf16.mxu1 %v1065_v10 }
  0x6e   :  { %783 = vmatpush3.bf16.msra.mxu0 %v907_v31 }
  0x6f   :  { %838 = vmatprep.subr.bf16.mxu0 %v1065_v10 }
  0x70   :  { %827 = vmatpush3.bf16.msra.mxu1 %v902_v26 }
  0x71   :  { %828 = vmatprep.subr.bf16.mxu1 %v1065_v10 }
  0x74   :  { %829 = vmatpush3.bf16.msra.mxu1 %v905_v29  ;;  %v756_v29 = vld [vmem:[%s1253_s6] ss:$0 sm:$0xff]  ;;  %s1067_s6 = smov [#allocation11]  }
  0x75   :  { %830 = vmatprep.subr.bf16.mxu1 %v1065_v10  ;;  %s711_s8 = sshll.u32 %s1067_s6, 4  ;;  %s712_s8 = int_to_ptr.vmem [resolvable:$true] %s711_s8 }
  0x76   :  { %s1026_s20 = scalar_lea.vmem %s712_s8, 16  ;;  %s1030_s21 = scalar_lea.vmem %s712_s8, 32 }
  0x77   :  { %p1027_p4 = scmp.ne.s32.totalorder %s712_s8, %s1026_s20  ;;  %p1031_p5 = scmp.lt.s32.totalorder %s712_s8, %s712_s8 }
  0x78   :  { %831 = vmatpush3.bf16.msra.mxu1 %v908_v32  ;;  %p1032_p6 = scmp.lt.s32.totalorder %s1030_s21, %s1026_s20 }
  0x79   :  { %832 = vmatprep.subr.bf16.mxu1 %v1065_v10 }
  0x7a   :  { %p1033_p7 = por %p1032_p6, %p1031_p5 }
  0x7c   :  { %833 = vmatpush3.bf16.msra.mxu1 %v909_v33  ;;  %p1034_p8 = pnand %p1033_p7, %p1027_p4 }
  0x7d   :  { %858 = vmatprep.subr.bf16.mxu1 %v1065_v10 }
 0x12a   :  { %v193_v41 = vpop.f32.mrb[0].mxu1 }
 0x12b   :  { %v194_v42 = vadd.f32 %v193_v41, %v106_v39  ;;  %v195_v43 = vpop.f32.mrb[1].mxu1  ;;  %v651_v41 = vld [vmem:[%s1254_s7] sm:$0x1] }
 0x12c   :  { %v196_v45 = vadd.f32 %v195_v43, %v110_v40  ;;  %v197_v46 = vpop.f32.mrb[2].mxu1  ;;  %v657_v43 = vpop.permute.xlu0 %656 }
 0x12d   :  { %918 = vtanh.f32 %v194_v42  ;;  %v198_v47 = vadd.f32 %v197_v46, %v106_v39  ;;  %v199_v48 = vpop.f32.mrb[3].mxu1  ;;  %v652_v42 = vpack.c.bf16 %v651_v41, %v651_v41  ;;  %v662_v44 = vrot.slane %v657_v43, %v105_v36 }
 0x12e   :  { %920 = vtanh.f32 %v196_v45  ;;  %v200_v49 = vadd.f32 %v199_v48, %v110_v40 }
 0x12f   :  { %922 = vtanh.f32 %v198_v47 }
 0x130   :  { %924 = vtanh.f32 %v200_v49 }
 0x132   :  { %v236_v51 = vpop.f32.mrb[4].mxu1 }
 0x133   :  { %v237_v52 = vadd.f32 %v236_v51, %v114_v50  ;;  %v816_v53 = vpop.f32.mrb[5].mxu1 }
 0x134   :  { %v239_v54 = vpop.f32.mrb[6].mxu1 }
 0x135   :  { %v240_v55 = vadd.f32 %v239_v54, %v114_v50  ;;  %v817_v56 = vpop.f32.mrb[7].mxu1  ;;  %926 = vtanh.f32 %v237_v52 }
 0x137   :  { %v919_v57 = vpop.eup %918  ;;  %928 = vtanh.f32 %v240_v55 }
 0x138   :  { %v921_v58 = vpop.eup %920 }
 0x139   :  { %v923_v59 = vpop.eup %922 }
 0x13a   :  { %v925_v60 = vpop.eup %924  ;;  %v249_v61 = vpack.c.bf16 %v923_v59, %v919_v57 }
 0x13b   :  { %v250_v62 = vpack.c.bf16 %v925_v60, %v921_v58 }
 0x13d   :  { %483 = vmatprep.mubr.bf16.mxu0 %v250_v62 }
 0x13e   :  { %484 = vmatmul.mubr.bf16.vlgmr.msra.gmra.mrb[0].mxu0 %v249_v61 }
 0x13f   :  { %839 = vmatpush3.bf16.msra.mxu0 %v910_v63  ;;  %854 = vmatprep.mubr.msk.bf16.mxu0 %vm1066_vm1, %v1065_v10  ;;  %v927_v1 = vpop.eup %926 }
 0x140   :  { %840 = vmatprep.subr.bf16.mxu0 %v1065_v10 }
 0x141   :  { %v929_v2 = vpop.eup %928 }
 0x142   :  { %v251_v3 = vpack.c.bf16 %v929_v2, %v927_v1 }
 0x143   :  { %841 = vmatpush3.bf16.msra.mxu0 %v911_v0 }
 0x144   :  { %835 = vmatmul.mubr.bf16.vlgmr.msra.gmra.mrb[8].mxu1 %v251_v3  ;;  %842 = vmatprep.subr.bf16.mxu0 %v1065_v10 }
 0x145   :  { %860 = vmatprep.mubr.msk.bf16.mxu1 %vm1066_vm1, %v1065_v10 }
 0x147   :  { %843 = vmatpush3.bf16.msra.mxu0 %v912_v4 }
 0x148   :  { %844 = vmatprep.subr.bf16.mxu0 %v1065_v10 }
 0x14b   :  { %845 = vmatpush3.bf16.msra.mxu0 %v913_v5 }
 0x14c   :  { %846 = vmatprep.subr.bf16.mxu0 %v1065_v10 }
 0x14f   :  { %847 = vmatpush3.bf16.msra.mxu0 %v914_v6 }
 0x150   :  { %848 = vmatprep.subr.bf16.mxu0 %v1065_v10 }
 0x153   :  { %849 = vmatpush3.bf16.msra.mxu0 %v915_v7 }
 0x154   :  { %850 = vmatprep.subr.bf16.mxu0 %v1065_v10 }
 0x157   :  { %851 = vmatpush3.bf16.msra.mxu0 %v916_v8 }
 0x158   :  { %852 = vmatprep.subr.bf16.mxu0 %v1065_v10 }
 0x15b   :  { %853 = vmatpush3.bf16.msra.mxu0 %v917_v9 }
 0x211   :  { %v784_v11 = vpop.f32.mrb[0].mxu0 }
 0x212   :  { %v785_v12 = vpop.f32.mrb[1].mxu0 }
 0x213   :  { %v786_v14 = vadd.f32 %v785_v12, %v784_v11  ;;  %v787_v15 = vpop.f32.mrb[2].mxu0 }
 0x214   :  { %v788_v16 = vpop.f32.mrb[3].mxu0 }
 0x215   :  { %v789_v17 = vadd.f32 %v788_v16, %v787_v15  ;;  %v486_v18 = vadd.f32 %v786_v14, %v731_v13 }
 0x217   :  { %v526_v19 = vpop.f32.mrb[8].mxu1  ;;  %v489_v20 = vadd.f32 %v789_v17, %v731_v13 }
 0x218   :  { %v527_v21 = vadd.f32 %v526_v19, %v486_v18  ;;  %v836_v22 = vpop.f32.mrb[9].mxu1 }
 0x219   :  { %v529_v23 = vpop.f32.mrb[10].mxu1 }
 0x21a   :  { %v530_v24 = vadd.f32 %v529_v23, %v489_v20  ;;  %v837_v25 = vpop.f32.mrb[11].mxu1  ;;  %930 = vtanh.f32 %v527_v21 }
 0x21c   :  { %932 = vtanh.f32 %v530_v24 }
 0x224   :  { %v931_v10 = vpop.eup %930 }
 0x226   :  { %v933_v26 = vpop.eup %932 }
 0x227   :  { %v535_v27 = vpack.c.bf16 %v933_v26, %v931_v10 }
 0x229   :  { %855 = vmatmul.mubr.bf16.vlgmr.msra.gmra.mrb[4].mxu0 %v535_v27 }
 0x2fc   :  { %v641_v30 = vpop.f32.mrb[4].mxu0 }
 0x2fd   :  { %v642_v31 = vadd.f32 %v756_v29, %v641_v30  ;;  %v856_v32 = vpop.f32.mrb[5].mxu0 }
 0x2fe   :  { %v644_v33 = vpop.f32.mrb[6].mxu0 }
 0x2ff   :  { %v645_v34 = vadd.f32 %v756_v29, %v644_v33  ;;  %v857_v37 = vpop.f32.mrb[7].mxu0  ;;  %934 = vtanh.f32 %v642_v31 }
 0x301   :  { %936 = vtanh.f32 %v645_v34 }
 0x309   :  { %v935_v38 = vpop.eup %934 }
 0x30b   :  { %v937_v39 = vpop.eup %936 }
 0x30c   :  { %v650_v40 = vpack.c.bf16 %v937_v39, %v935_v38 }
 0x30e   :  { %859 = vmatpush3.bf16.xpose.msra.mxu1 %v650_v40 }
 0x315   :  { %861 = vmatmul.mubr.bf16.vlgmr.msra.gmra.mrb[12].mxu1 %v652_v42 }
 0x3e8   :  { %v697_v45 = vpop.f32.mrb[12].mxu1 }
 0x3e9   :  { %v698_v46 = vadd.f32 %v697_v45, %v662_v44  ;;  %v862_v47 = vpop.f32.mrb[13].mxu1 }
 0x3ea   :  { %v700_v48 = vpop.f32.mrb[14].mxu1 }
 0x3eb   :  { %v863_v49 = vpop.f32.mrb[15].mxu1  ;;  %704 = vst.msk [vmem:[#allocation11] sm:$0x1] %vm703_vm2, %v698_v46 }
 0x3ec   :  { %1037 = shalt.err (!%p1034_p8)
}
 0x3ed   :  { %s1038_s23 = scalar_lea.hbm %s1256_s9, 16 }
 0x3ee   :  { %p1039_p9 = scmp.ne.s32.totalorder %s1256_s9, %s1038_s23  ;;  %p1042_p10 = scmp.lt.u32.totalorder %s1038_s23, %s1256_s9 }
 0x3f0   :  { %p1044_p11 = pnand %p1042_p10, %p1039_p9 }
 0x3f2   :  { %1047 = shalt.err (!%p1044_p11)
}
 0x3f3   :  { %714 = dma.vmem_to_hbm [thread:$0]  %s712_s8, 16, %s1256_s9, [#allocation5]  }
 0x3f4   :  { %1054 = dma.done.wait [#allocation5], 16  }
 0x3f5   :  { %1055 = vsyncadd [#allocation5], 4294967280 }
 0x3f6   :  { %718 = vsyncpa [#allocation4], 1 }
 0x3f7   :  { %719 = vsyncpa [#allocation7], 1 }
 0x3f8   :  { %720 = vsyncpa [#allocation10], 1 }
 0x3f9   :  { %721 = vsyncpa [#allocation5], 1 }

</bundles_post_ra>
